<compile_context>
chip_gen: v7x
topology: tpu7x:2x2x1
jax: 0.10.0
libtpu: 0.0.40
codegen_flags: <defaults>
</compile_context>

<pallas_src>
import functools

import jax
import jax.numpy as jnp
from jax.experimental import pallas as pl
from jax.experimental.pallas import tpu as pltpu

EPS = 1e-06
LANE = 128
BLOCK_BYTES = 4 * 1024 * 1024        # per input per grid step, native dtype
VMEM_LIMIT_BYTES = 32 * 1024 * 1024  # 2 inputs x 2 buffers x 4 MiB + scratch


def _cdiv(a, b):
    return (a + b - 1) // b


def _jaccard_partial_kernel(x_ref, t_ref, out_ref, acc_ref, *,
                            block_rows, acc_rows, valid_rows,
                            tiles_per_split, any_tail):
    """grid = (groups, splits, tiles); reduction axis (tiles) is last.

    Emits per-(group, split) partials:
      out[., 0] = sum(x * t)          (intersection)
      out[., 1] = sum(x) + sum(t)     (for the union)
    """
    s = pl.program_id(1)
    j = pl.program_id(2)

    @pl.when(j == 0)
    def _():
        acc_ref[...] = jnp.zeros_like(acc_ref)

    x = x_ref[0].astype(jnp.float32)      # (block_rows, LANE), in-kernel cast
    t = t_ref[0].astype(jnp.float32)
    prod = x * t                          # -> intersection
    ssum = x + t                          # -> sum(x) + sum(t)

    def tile_partial(v):
        # Reduce (block_rows, LANE) -> (acc_rows, LANE).  acc_rows/8 independent
        # vreg chains per plane keep this VPU-throughput (not latency) bound.
        if acc_rows == block_rows:
            return v
        return jnp.sum(v.reshape(block_rows // acc_rows, acc_rows, LANE), axis=0)

    if any_tail:
        tile_idx = s * tiles_per_split + j
        row_start = tile_idx * block_rows
        is_tail = row_start + block_rows > valid_rows

        @pl.when(jnp.logical_not(is_tail))
        def _():  # fast path: interior tiles, no mask work at all
            acc_ref[0] += tile_partial(prod)
            acc_ref[1] += tile_partial(ssum)

        @pl.when(is_tail)
        def _():  # tail / duplicated tile: zero the rows past valid_rows
            r = jax.lax.broadcasted_iota(jnp.int32, (block_rows, 1), 0)
            ok = (row_start + r) < valid_rows
            acc_ref[0] += tile_partial(jnp.where(ok, prod, 0.0))
            acc_ref[1] += tile_partial(jnp.where(ok, ssum, 0.0))
    else:
        acc_ref[0] += tile_partial(prod)
        acc_ref[1] += tile_partial(ssum)

    @pl.when(j == pl.num_programs(2) - 1)
    def _():
        # Single cross-lane/sublane reduction, once per (group, split).
        out_ref[0, 0] = jnp.sum(acc_ref[0])
        out_ref[0, 1] = jnp.sum(acc_ref[1])


def jaccard_loss(outputs, targets, per_image=False, *, block_rows_cap=None):
    """Pallas equivalent of jaccard(outputs, targets, per_image)."""
    B = outputs.shape[0]
    b_eff = B if per_image else 1

    x = outputs.reshape(b_eff, -1)        # free (contiguous) reshape, no cast
    t = targets.reshape(b_eff, -1)
    n = x.shape[1]

    rows = _cdiv(n, LANE)
    n_pad = rows * LANE
    if n_pad != n:
        # TODO(synk): rare ragged-lane case (flat size % 128 != 0).  An
        # in-kernel 2-D element mask on the tail tile would avoid this HBM
        # copy; kept as a zero-pad (sum-neutral) since the in-kernel mask
        # below only covers whole 128-lane rows.
        x = jnp.pad(x, ((0, 0), (0, n_pad - n)))
        t = jnp.pad(t, ((0, 0), (0, n_pad - n)))

    x3 = x.reshape(b_eff, rows, LANE)     # free (contiguous) reshape
    t3 = t.reshape(b_eff, rows, LANE)

    x_item = x3.dtype.itemsize
    t_item = t3.dtype.itemsize
    sub = 32 // min(x_item, t_item)       # sublane multiple: 8 f32 / 16 bf16 / 32 i8
    # ~4 MiB per input per grid step in native dtype (8192 rows f32, 16384 bf16).
    target = max(64, (BLOCK_BYTES // (LANE * max(x_item, t_item))) // 64 * 64)
    if block_rows_cap is not None:        # test knob to exercise the tiled path
        target = min(target, max(sub, (block_rows_cap // sub) * sub))
    block_rows = rows if rows <= target else target

    tiles_total = _cdiv(rows, block_rows)
    splits = 2 if tiles_total >= 2 else 1          # feed both v7x TensorCores
    tiles_per_split = _cdiv(tiles_total, splits)
    any_tail = splits * tiles_per_split * block_rows != rows

    acc_rows = block_rows                 # K-way accumulator granularity
    for d in (64, 32, 16, 8):
        if block_rows % d == 0:
            acc_rows = d
            break

    def in_map(g, s, j):
        # Clamp so the (at most one) overhanging grid step never issues an
        # out-of-bounds DMA; its contribution is zeroed by the in-kernel mask.
        return (g, jnp.minimum(s * tiles_per_split + j, tiles_total - 1), 0)

    kernel = functools.partial(
        _jaccard_partial_kernel,
        block_rows=block_rows, acc_rows=acc_rows, valid_rows=rows,
        tiles_per_split=tiles_per_split, any_tail=any_tail)

    total = b_eff * rows * LANE
    cost = pl.CostEstimate(
        flops=4 * total,
        transcendentals=0,
        bytes_accessed=total * (x_item + t_item) + b_eff * splits * 2 * 4)

    partials = pl.pallas_call(
        kernel,
        out_shape=jax.ShapeDtypeStruct((b_eff * splits, 2), jnp.float32),
        grid_spec=pltpu.PrefetchScalarGridSpec(
            num_scalar_prefetch=0,
            grid=(b_eff, splits, tiles_per_split),
            in_specs=[
                pl.BlockSpec((1, block_rows, LANE), in_map),
                pl.BlockSpec((1, block_rows, LANE), in_map),
            ],
            out_specs=pl.BlockSpec((1, 2), lambda g, s, j: (g * splits + s, 0),
                                   memory_space=pltpu.SMEM),
            scratch_shapes=[pltpu.VMEM((2, acc_rows, LANE), jnp.float32)],
        ),
        compiler_params=pltpu.CompilerParams(
            dimension_semantics=("parallel", "parallel", "arbitrary"),
            vmem_limit_bytes=VMEM_LIMIT_BYTES,
        ),
        cost_estimate=cost,
    )(x3, t3)

    # Combine the per-(group, split) partials; tiny jaccard formula in plain JAX.
    per_image_sums = partials.reshape(b_eff, splits, 2).sum(axis=1)
    inter = per_image_sums[:, 0]
    union = per_image_sums[:, 1] - inter + EPS     # sum(x) + sum(t) - inter + eps
    losses = 1.0 - (inter + EPS) / union
    return jnp.mean(losses)                        # losses.mean() as in PyTorch


class JaccardLoss:
    """Mirror of the PyTorch module (the `weight` buffer is unused in forward)."""

    def __init__(self, weight=None, size_average=True, per_image=False):
        self.weight = weight
        self.size_average = size_average
        self.per_image = per_image

    def __call__(self, input, target):
        return jaccard_loss(input, target, per_image=self.per_image)


def _jaccard_ref(outputs, targets, per_image=False):
    B = outputs.shape[0]
    b_eff = B if per_image else 1
    do = outputs.reshape(b_eff, -1).astype(jnp.float32)
    dt = targets.reshape(b_eff, -1).astype(jnp.float32)
    inter = jnp.sum(do * dt, axis=1)
    union = jnp.sum(do, axis=1) + jnp.sum(dt, axis=1) - inter + EPS
    return jnp.mean(1.0 - (inter + EPS) / union)


if __name__ == "__main__":
    key = jax.random.PRNGKey(0)
    k1, k2, k3, k4 = jax.random.split(key, 4)

    # 1) canonical small NCHW case: batch=2, channels=4, spatial=16x16
    logits = jax.random.normal(k1, (2, 4, 16, 16), dtype=jnp.float32)
    outputs = jax.nn.sigmoid(logits)                 # probabilities
    targets = (jax.random.uniform(k2, (2, 4, 16, 16)) > 0.5).astype(jnp.float32)
    for per_image in (False, True):
        loss = JaccardLoss(per_image=per_image)(outputs, targets)
        jax.block_until_ready(loss)
        ref = _jaccard_ref(outputs, targets, per_image=per_image)
        assert jnp.allclose(loss, ref, atol=1e-5, rtol=1e-5), (per_image, loss, ref)

    # 2) exercise the tiled + masked-tail + 2-way-split (and, for per_image=True,
    #    the ragged-lane pad) paths with a tiny block cap and awkward spatial size
    lg2 = jax.random.normal(k3, (2, 4, 20, 20), dtype=jnp.float32)
    out2 = jax.nn.sigmoid(lg2)
    tgt2 = (jax.random.uniform(k4, (2, 4, 20, 20)) > 0.5).astype(jnp.float32)
    for per_image in (False, True):
        loss = jaccard_loss(out2, tgt2, per_image=per_image, block_rows_cap=8)
        jax.block_until_ready(loss)
        ref = _jaccard_ref(out2, tgt2, per_image=per_image)
        assert jnp.allclose(loss, ref, atol=1e-5, rtol=1e-5), (per_image, loss, ref)

    # 3) mixed-dtype inputs (bf16 targets) exercise the dtype-aware path
    tgt_bf16 = targets.astype(jnp.bfloat16)
    loss = jaccard_loss(outputs, tgt_bf16, per_image=False)
    jax.block_until_ready(loss)
    ref = _jaccard_ref(outputs, tgt_bf16, per_image=False)
    assert jnp.allclose(loss, ref, atol=1e-5, rtol=1e-5), (loss, ref)

    print("KERNEL_OK")
</pallas_src>

<mosaic_0001>
module attributes {stable_mosaic.version = 11 : i64} {
  func.func @_jaccard_partial_kernel(%arg0: i32, %arg1: i32, %arg2: i32, %arg3: memref<1x16x128xf32, #tpu.memory_space<vmem>>, %arg4: memref<1x16x128xf32, #tpu.memory_space<vmem>>, %arg5: memref<1x2xf32, #tpu.memory_space<smem>>, %arg6: memref<2x16x128xf32, #tpu.memory_space<vmem>>) attributes {dimension_semantics = [#tpu.dimension_semantics<parallel>, #tpu.dimension_semantics<parallel>, #tpu.dimension_semantics<arbitrary>], iteration_bounds = array<i64: 1, 1, 1>, scalar_prefetch = 0 : i64, scratch_operands = 1 : i64, tpu.core_type = #tpu.core_type<tc>, window_params = [{transform_indices = @transform_0, window_bounds = array<i64: 1, 16, 128>}, {transform_indices = @transform_1, window_bounds = array<i64: 1, 16, 128>}, {transform_indices = @transform_2, window_bounds = array<i64: 1, 2>}]} {
    %c0_i32 = arith.constant 0 : i32
    %0 = arith.cmpi eq, %arg2, %c0_i32 : i32
    %1 = arith.extui %0 : i1 to i32
    %c0_i32_0 = arith.constant 0 : i32
    %2 = arith.cmpi ne, %1, %c0_i32_0 : i32
    scf.if %2 {
      %cst = arith.constant 0.000000e+00 : f32
      %24 = vector.broadcast %cst : f32 to vector<2x16x128xf32>
      %c0_19 = arith.constant 0 : index
      %c0_20 = arith.constant 0 : index
      %c0_21 = arith.constant 0 : index
      %25 = vector.load %arg6[%c0_19, %c0_20, %c0_21] : memref<2x16x128xf32, #tpu.memory_space<vmem>>, vector<2x16x128xf32>
      tpu.vector_store %arg6[%c0_19, %c0_20, %c0_21], %24 {strides = array<i32>} : memref<2x16x128xf32, #tpu.memory_space<vmem>>, vector<2x16x128xf32>,
    } else {
    }
    %c0 = arith.constant 0 : index
    %c0_1 = arith.constant 0 : index
    %c0_2 = arith.constant 0 : index
    %3 = vector.load %arg3[%c0, %c0_1, %c0_2] : memref<1x16x128xf32, #tpu.memory_space<vmem>>, vector<1x16x128xf32>
    %4 = vector.shape_cast %3 : vector<1x16x128xf32> to vector<16x128xf32>
    %c0_3 = arith.constant 0 : index
    %c0_4 = arith.constant 0 : index
    %c0_5 = arith.constant 0 : index
    %5 = vector.load %arg4[%c0_3, %c0_4, %c0_5] : memref<1x16x128xf32, #tpu.memory_space<vmem>>, vector<1x16x128xf32>
    %6 = vector.shape_cast %5 : vector<1x16x128xf32> to vector<16x128xf32>
    %7 = arith.mulf %4, %6 : vector<16x128xf32>
    %8 = arith.addf %4, %6 : vector<16x128xf32>
    %c0_6 = arith.constant 0 : index
    %c0_7 = arith.constant 0 : index
    %c0_8 = arith.constant 0 : index
    %9 = vector.load %arg6[%c0_6, %c0_7, %c0_8] : memref<2x16x128xf32, #tpu.memory_space<vmem>>, vector<1x16x128xf32>
    %10 = vector.shape_cast %9 : vector<1x16x128xf32> to vector<16x128xf32>
    %11 = arith.addf %10, %7 : vector<16x128xf32>
    %c0_9 = arith.constant 0 : index
    %c0_10 = arith.constant 0 : index
    %c0_11 = arith.constant 0 : index
    %12 = vector.load %arg6[%c0_9, %c0_10, %c0_11] : memref<2x16x128xf32, #tpu.memory_space<vmem>>, vector<1x16x128xf32>
    %13 = vector.shape_cast %12 : vector<1x16x128xf32> to vector<16x128xf32>
    %14 = vector.shape_cast %11 : vector<16x128xf32> to vector<1x16x128xf32>
    tpu.vector_store %arg6[%c0_9, %c0_10, %c0_11], %14 {strides = array<i32>} : memref<2x16x128xf32, #tpu.memory_space<vmem>>, vector<1x16x128xf32>,
    %c1 = arith.constant 1 : index
    %c0_12 = arith.constant 0 : index
    %c0_13 = arith.constant 0 : index
    %15 = vector.load %arg6[%c1, %c0_12, %c0_13] : memref<2x16x128xf32, #tpu.memory_space<vmem>>, vector<1x16x128xf32>
    %16 = vector.shape_cast %15 : vector<1x16x128xf32> to vector<16x128xf32>
    %17 = arith.addf %16, %8 : vector<16x128xf32>
    %c1_14 = arith.constant 1 : index
    %c0_15 = arith.constant 0 : index
    %c0_16 = arith.constant 0 : index
    %18 = vector.load %arg6[%c1_14, %c0_15, %c0_16] : memref<2x16x128xf32, #tpu.memory_space<vmem>>, vector<1x16x128xf32>
    %19 = vector.shape_cast %18 : vector<1x16x128xf32> to vector<16x128xf32>
    %20 = vector.shape_cast %17 : vector<16x128xf32> to vector<1x16x128xf32>
    tpu.vector_store %arg6[%c1_14, %c0_15, %c0_16], %20 {strides = array<i32>} : memref<2x16x128xf32, #tpu.memory_space<vmem>>, vector<1x16x128xf32>,
    %c0_i32_17 = arith.constant 0 : i32
    %21 = arith.cmpi eq, %arg2, %c0_i32_17 : i32
    %22 = arith.extui %21 : i1 to i32
    %c0_i32_18 = arith.constant 0 : i32
    %23 = arith.cmpi ne, %22, %c0_i32_18 : i32
    scf.if %23 {
      %c0_19 = arith.constant 0 : index
      %c0_20 = arith.constant 0 : index
      %c0_21 = arith.constant 0 : index
      %24 = vector.load %arg6[%c0_19, %c0_20, %c0_21] : memref<2x16x128xf32, #tpu.memory_space<vmem>>, vector<1x16x128xf32>
      %25 = vector.shape_cast %24 : vector<1x16x128xf32> to vector<16x128xf32>
      %26 = vector.shape_cast %25 : vector<16x128xf32> to vector<1x16x128xf32>
      %cst = arith.constant dense<0.000000e+00> : vector<1xf32>
      %27 = vector.multi_reduction <add>, %26, %cst [1, 2] : vector<1x16x128xf32> to vector<1xf32>
      %28 = vector.shape_cast %27 : vector<1xf32> to vector<1x1x1xf32>
      %29 = vector.extract %28[0, 0, 0] : f32 from vector<1x1x1xf32>
      %c0_22 = arith.constant 0 : index
      %c0_23 = arith.constant 0 : index
      %30 = memref.load %arg5[%c0_22, %c0_23] : memref<1x2xf32, #tpu.memory_space<smem>>
      memref.store %29, %arg5[%c0_22, %c0_23] : memref<1x2xf32, #tpu.memory_space<smem>>
      %c1_24 = arith.constant 1 : index
      %c0_25 = arith.constant 0 : index
      %c0_26 = arith.constant 0 : index
      %31 = vector.load %arg6[%c1_24, %c0_25, %c0_26] : memref<2x16x128xf32, #tpu.memory_space<vmem>>, vector<1x16x128xf32>
      %32 = vector.shape_cast %31 : vector<1x16x128xf32> to vector<16x128xf32>
      %33 = vector.shape_cast %32 : vector<16x128xf32> to vector<1x16x128xf32>
      %cst_27 = arith.constant dense<0.000000e+00> : vector<1xf32>
      %34 = vector.multi_reduction <add>, %33, %cst_27 [1, 2] : vector<1x16x128xf32> to vector<1xf32>
      %35 = vector.shape_cast %34 : vector<1xf32> to vector<1x1x1xf32>
      %36 = vector.extract %35[0, 0, 0] : f32 from vector<1x1x1xf32>
      %c0_28 = arith.constant 0 : index
      %c1_29 = arith.constant 1 : index
      %37 = memref.load %arg5[%c0_28, %c1_29] : memref<1x2xf32, #tpu.memory_space<smem>>
      memref.store %36, %arg5[%c0_28, %c1_29] : memref<1x2xf32, #tpu.memory_space<smem>>
    } else {
    }
    return
  }
  func.func @transform_0(%arg0: i32, %arg1: i32, %arg2: i32) -> (i32, i32, i32) {
    %c1_i32 = arith.constant 1 : i32
    %0 = arith.muli %arg1, %c1_i32 : i32
    %1 = arith.addi %0, %arg2 : i32
    %c0_i32 = arith.constant 0 : i32
    %2 = arith.minsi %1, %c0_i32 : i32
    %c0_i32_0 = arith.constant 0 : i32
    %c0_i32_1 = arith.constant 0 : i32
    return %arg0, %2, %c0_i32_0 : i32, i32, i32
  }
  func.func @transform_1(%arg0: i32, %arg1: i32, %arg2: i32) -> (i32, i32, i32) {
    %c1_i32 = arith.constant 1 : i32
    %0 = arith.muli %arg1, %c1_i32 : i32
    %1 = arith.addi %0, %arg2 : i32
    %c0_i32 = arith.constant 0 : i32
    %2 = arith.minsi %1, %c0_i32 : i32
    %c0_i32_0 = arith.constant 0 : i32
    %c0_i32_1 = arith.constant 0 : i32
    return %arg0, %2, %c0_i32_0 : i32, i32, i32
  }
  func.func @transform_2(%arg0: i32, %arg1: i32, %arg2: i32) -> (i32, i32) {
    %c1_i32 = arith.constant 1 : i32
    %0 = arith.muli %arg0, %c1_i32 : i32
    %1 = arith.addi %0, %arg1 : i32
    %c0_i32 = arith.constant 0 : i32
    %c0_i32_0 = arith.constant 0 : i32
    return %1, %c0_i32 : i32, i32
  }
}

</mosaic_0001>

<bundles_post_ra>
// kernel: tpu_custom_call.1
= control target key start
LH: loop header
LB: loop body
LE: loop exit
PB: predicated region body
PF: predicated region fallthrough
CT: control target
= control target key end

     0   :  { %7 = vsyncpa [#allocation4], 0  ;;  %s268_s0 = inlined_call_operand.hbm [shape: f32[1,16,128], index: 0, kind: input, shape index: {}]   ;;  %s269_s1 = inlined_call_operand.hbm [shape: f32[1,16,128], index: 1, kind: input, shape index: {}]   ;;  %s270_s2 = inlined_call_operand.hbm [shape: f32[1,2], index: 2, kind: output, shape index: {}]  }
   0x1   :  { %8 = vsyncpa [#allocation7], 0 }
   0x2   :  { %9 = vsyncpa [#allocation5], 0  ;;  %s212_s9 = smov [#allocation3]   ;;  %s152_s13 = scalar_lea.hbm %s268_s0, 256 }
   0x3   :  { %s21_s10 = sshll.u32 %s212_s9, 4  ;;  %p153_p0 = scmp.ne.s32.totalorder %s268_s0, %s152_s13  ;;  %s22_s10 = int_to_ptr.vmem [resolvable:$true] %s21_s10 }
   0x4   :  { %p156_p1 = scmp.lt.u32.totalorder %s152_s13, %s268_s0 }
   0x6   :  { %p158_p2 = pnand %p156_p1, %p153_p0 }
   0x8   :  { %161 = shalt.err (!%p158_p2)
}
   0x9   :  { %s162_s18 = scalar_lea.vmem %s22_s10, 256  ;;  %p167_p4 = scmp.lt.s32.totalorder %s22_s10, %s22_s10 }
   0xa   :  { %p163_p3 = scmp.ne.s32.totalorder %s22_s10, %s162_s18  ;;  %p168_p5 = scmp.lt.s32.totalorder %s162_s18, %s162_s18 }
   0xc   :  { %p169_p6 = por %p168_p5, %p167_p4 }
   0xe   :  { %p170_p7 = pnand %p169_p6, %p163_p3 }
  0x10   :  { %173 = shalt.err (!%p170_p7)
}
  0x11   :  { %s213_s19 = smov 128   ;;  %s214_s20 = smov 8  }
  0x12   :  { %27 = dma.hbm_to_vmem [thread:$0]  %s268_s0, 256, %s22_s10, [#allocation4], %s213_s19, %s213_s19, %s214_s20  }
  0x13   :  { %s215_s23 = smov [#allocation6]   ;;  %s174_s27 = scalar_lea.hbm %s269_s1, 256 }
  0x14   :  { %s39_s24 = sshll.u32 %s215_s23, 4  ;;  %p175_p8 = scmp.ne.s32.totalorder %s269_s1, %s174_s27  ;;  %s40_s24 = int_to_ptr.vmem [resolvable:$true] %s39_s24 }
  0x15   :  { %p178_p9 = scmp.lt.u32.totalorder %s174_s27, %s269_s1 }
  0x17   :  { %p180_p10 = pnand %p178_p9, %p175_p8 }
  0x19   :  { %183 = shalt.err (!%p180_p10)
}
  0x1a   :  { %s184_s4 = scalar_lea.vmem %s40_s24, 256  ;;  %p189_p12 = scmp.lt.s32.totalorder %s40_s24, %s40_s24 }
  0x1b   :  { %p185_p11 = scmp.ne.s32.totalorder %s40_s24, %s184_s4  ;;  %p190_p13 = scmp.lt.s32.totalorder %s184_s4, %s184_s4 }
  0x1d   :  { %p191_p0 = por %p190_p13, %p189_p12 }
  0x1f   :  { %p192_p1 = pnand %p191_p0, %p185_p11 }
  0x21   :  { %195 = shalt.err (!%p192_p1)
}
  0x22   :  { %45 = dma.hbm_to_vmem [thread:$0]  %s269_s1, 256, %s40_s24, [#allocation7], %s213_s19, %s213_s19, %s214_s20  }
  0x23   :  { %206 = dma.done.wait [#allocation4], 256  }
  0x24   :  { %207 = vsyncadd [#allocation4], 4294967040 }
  0x25   :  { %208 = dma.done.wait [#allocation7], 256  }
  0x26   :  { %209 = vsyncadd [#allocation7], 4294967040  ;;  %v69_v0 = vld [vmem:[#allocation3] sm:$0xff]  ;;  %v70_v1 = vld [vmem:[#allocation3 + $0x8] sm:$0xff]  ;;  %s196_s9 = scalar_lea.hbm %s270_s2, 16 }
  0x27   :  { %v71_v2 = vld [vmem:[#allocation6] sm:$0xff]  ;;  %v72_v3 = vld [vmem:[#allocation6 + $0x8] sm:$0xff]  ;;  %p197_p2 = scmp.ne.s32.totalorder %s270_s2, %s196_s9  ;;  %p200_p3 = scmp.lt.u32.totalorder %s196_s9, %s270_s2 }
  0x28   :  { %v73_v4 = vmul.f32 %v71_v2, %v69_v0  ;;  %v74_v5 = vmul.f32 %v72_v3, %v70_v1  ;;  %v75_v6 = vadd.f32 %v71_v2, %v69_v0  ;;  %v76_v7 = vadd.f32 %v72_v3, %v70_v1 }
  0x29   :  { %p202_p4 = pnand %p200_p3, %p197_p2 }
  0x2a   :  { %v95_v8 = vadd.f32 %v74_v5, %v73_v4  ;;  %v109_v9 = vadd.f32 %v76_v7, %v75_v6 }
  0x2c   :  { %96 = vadd.xlane.f32.xlu0 %v95_v8 }
  0x30   :  { %110 = vadd.xlane.f32.xlu0 %v109_v9 }
  0xb9   :  { %v97_v10 = vpop.xlane.xlu0 %96 }
  0xba   :  { %v98_v11 = vrot.slane %v97_v10, 4 }
  0xbc   :  { %v99_v12 = vadd.f32 %v98_v11, %v97_v10 }
  0xbd   :  { %v111_v13 = vpop.xlane.xlu0 %110 }
  0xbe   :  { %v100_v14 = vrot.slane %v99_v12, 2  ;;  %v112_v15 = vrot.slane %v111_v13, 4 }
  0xc0   :  { %v113_v16 = vadd.f32 %v112_v15, %v111_v13  ;;  %v101_v17 = vadd.f32 %v100_v14, %v99_v12 }
  0xc2   :  { %v114_v18 = vrot.slane %v113_v16, 2  ;;  %v102_v19 = vrot.slane %v101_v17, 1 }
  0xc4   :  { %v115_v20 = vadd.f32 %v114_v18, %v113_v16  ;;  %v103_v21 = vadd.f32 %v102_v19, %v101_v17 }
  0xc6   :  { %143 = vpush %v103_v21  ;;  %v116_v22 = vrot.slane %v115_v20, 1 }
  0xc8   :  { %v117_v23 = vadd.f32 %v116_v22, %v115_v20 }
  0xca   :  { %145 = vpush %v117_v23 }
  0xf7   :  { %s144_s1 = spop %143 }
  0xf8   :  { %106 = sst [smem:[#allocation8]] %s144_s1 }
  0xfb   :  { %s146_s6 = spop %145 }
  0xfc   :  { %120 = sst [smem:[#allocation8 + $0x1]] %s146_s6 }
  0xfd   :  { %205 = shalt.err (!%p202_p4)
}
  0xfe   :  { %s216_s14 = smov [#allocation8]  }
  0xff   :  { %131 = dma.smem_to_hbm %s216_s14, 16, %s270_s2, [#allocation5]  }
 0x100   :  { %210 = dma.done.wait [#allocation5], 16  }
 0x101   :  { %211 = vsyncadd [#allocation5], 4294967280 }
 0x102   :  { %135 = sfence }
 0x103   :  { %136 = vsyncpa [#allocation4], 1 }
 0x104   :  { %137 = vsyncpa [#allocation7], 1 }
 0x105   :  { %138 = vsyncpa [#allocation5], 1 }

</bundles_post_ra>
